<compile_context>
chip_gen: v5e
topology: v5e:2x2
jax: 0.10.0
libtpu: 0.0.40
codegen_flags: <defaults>
</compile_context>

<pallas_src>
import jax
import jax.numpy as jnp
from jax import lax
from jax.experimental import pallas as pl
from jax.experimental.pallas import tpu as pltpu

LEAKY_SLOPE = 0.01   # F.leaky_relu default negative slope
BN_EPS = 1e-5        # nn.BatchNorm1d default eps

# murmur3 / golden-ratio constants as signed int32 bit patterns
_MUR1 = -2048144789   # 0x85EBCA6B
_MUR2 = -1028477387   # 0xC2B2AE35
_GOLD = -1640531527   # 0x9E3779B1
_SALT = 1779033703    # 0x6A09E667


def _round_up(x, m):
    return (x + m - 1) // m * m


def _cdiv(a, b):
    return -(-a // b)


def _i32(v):
    """Wrap a python int into signed-int32 range."""
    v &= 0xFFFFFFFF
    return v - (1 << 32) if v >= (1 << 31) else v


def _srl(x, k):
    """Logical right shift of an int32 array by k bits (arithmetic shift + mask)."""
    mask = (1 << (32 - k)) - 1
    return jnp.bitwise_and(jnp.right_shift(x, k), jnp.int32(mask))


def _vmem_cap_bytes():
    """Physical VMEM per TensorCore minus ~8 MiB headroom (v7x: ~56 MiB, v5e/v6e: ~120 MiB)."""
    try:
        info = pltpu.get_tpu_info()
        for attr in ("vmem_capacity_bytes", "vmem_bytes", "vmem_size_bytes"):
            cap = getattr(info, attr, None)
            if cap:
                return max(32 << 20, int(cap) - (8 << 20))
    except Exception:
        pass
    return 56 << 20   # conservative fallback: safe on every generation


def _make_kernel(num_hidden, hidden_wps, max_wp, bt, dropout_p, apply_dropout, seed):
    """Fused MLP kernel.  Ref layout: x_ref, per hidden layer (W_folded, b_folded),
    then (W_out, b_out), then the output ref."""
    use_dropout = bool(apply_dropout) and dropout_p > 0.0 and num_hidden > 0
    # keep element iff top-31 hash bits >= thr31  (P[keep] = 1 - p, up to 2^-31 quantization)
    thr31 = min(int(dropout_p * 2147483648.0), 2147483647)
    salts = [_i32(seed + (li + 1) * _SALT) for li in range(num_hidden)]

    def _fmix31(h):
        # murmur3 fmix32 finalizer (vector * splat-constant int32 muls only), 31-bit result
        h = h ^ _srl(h, 16)
        h = h * jnp.int32(_MUR1)
        h = h ^ _srl(h, 13)
        h = h * jnp.int32(_MUR2)
        h = h ^ _srl(h, 16)
        return jnp.bitwise_and(h, jnp.int32(0x7FFFFFFF))

    def kernel(x_ref, *refs):
        o_ref = refs[-1]
        params = refs[:-1]

        if use_dropout:
            # layer-invariant hash prefix, computed once per tile (global row encodes the MC sample)
            row0 = pl.program_id(0) * bt
            rows = lax.broadcasted_iota(jnp.int32, (bt, max_wp), 0) + row0
            cols = lax.broadcasted_iota(jnp.int32, (bt, max_wp), 1)
            h0 = rows * jnp.int32(_MUR1) + cols

        h = x_ref[...]
        for li in range(num_hidden):
            w_ref, b_ref = params[2 * li], params[2 * li + 1]
            # Linear with eval-mode BatchNorm (and previous layer's dropout rescale) folded into W', b'.
            h = jnp.dot(h.astype(w_ref.dtype), w_ref[...],
                        preferred_element_type=jnp.float32) + b_ref[...]
            # LeakyReLU
            h = jnp.where(h > 0, h, LEAKY_SLOPE * h)
            # Dropout (MC-dropout: active whenever `sample or training`); rescale folded into weights.
            if use_dropout:
                wp = hidden_wps[li]
                base = h0 if wp == max_wp else h0[:, :wp]
                r = _fmix31(base ^ jnp.int32(salts[li]))
                h = jnp.where(r >= jnp.int32(thr31), h, 0.0)

        w_ref, b_ref = params[-2], params[-1]
        out = jnp.dot(h.astype(w_ref.dtype), w_ref[...],
                      preferred_element_type=jnp.float32) + b_ref[...]
        o_ref[...] = out.astype(o_ref.dtype)

    return kernel


def prepare_params(params, *, sample=True, dropout=0.3, weight_dtype=jnp.bfloat16):
    """Fold BN (eval running stats) + dropout 1/(1-p) rescale into the Linear weights, cast to
    `weight_dtype` and zero-pad every feature dim to a multiple of 128.  Call once and cache."""
    assert 0.0 <= dropout < 1.0, "dropout rate must be in [0, 1)"
    apply_dropout = bool(sample) and dropout > 0.0
    inv_keep = 1.0 / (1.0 - dropout) if apply_dropout else 1.0

    hidden = params["hidden"]
    w_out, b_out = params["out"]
    in_dim = hidden[0][0].shape[0] if hidden else w_out.shape[0]
    out_dim = w_out.shape[1]

    flat = []
    hidden_wps = []
    h_in = in_dim
    h_in_p = _round_up(in_dim, 128)
    dp = h_in_p
    for li, (w, b, gamma, beta, mean, var) in enumerate(hidden):
        h_out = w.shape[1]
        h_out_p = _round_up(h_out, 128)
        scale = gamma * lax.rsqrt(var + BN_EPS)                       # (1, h_out)
        w_f = w * scale
        if li > 0:
            w_f = w_f * inv_keep          # fold previous layer's dropout rescale into W (not b)
        b_f = (b - mean) * scale + beta
        w_pad = jnp.zeros((h_in_p, h_out_p), weight_dtype).at[:h_in, :h_out].set(
            w_f.astype(weight_dtype))
        b_pad = jnp.zeros((1, h_out_p), jnp.float32).at[:, :h_out].set(
            b_f.astype(jnp.float32))
        flat += [w_pad, b_pad]
        hidden_wps.append(h_out_p)
        h_in, h_in_p = h_out, h_out_p

    op = _round_up(out_dim, 128)
    w_o = w_out * inv_keep if (hidden and apply_dropout) else w_out
    w_out_pad = jnp.zeros((h_in_p, op), weight_dtype).at[:h_in, :out_dim].set(
        w_o.astype(weight_dtype))
    b_out_pad = jnp.zeros((1, op), jnp.float32).at[:, :out_dim].set(
        b_out.astype(jnp.float32))
    flat += [w_out_pad, b_out_pad]

    return {
        "flat": tuple(flat),
        "in_dim": int(in_dim), "out_dim": int(out_dim),
        "dp": int(dp), "op": int(op),
        "hidden_wps": tuple(int(w) for w in hidden_wps),
        "num_hidden": len(hidden),
        "dropout": float(dropout),
        "apply_dropout": bool(apply_dropout),
        "weight_dtype": weight_dtype,
    }


def _forward_prepared(x, n_samples, prep, *, seed=1234, row_tile=512):
    """x: (s_x, batch, in_dim) with s_x in {1, n_samples}.  s_x == 1 means the same input is reused
    for every MC sample (run()/sample_predict() path); it is broadcast into the collapsed row slab."""
    assert row_tile % 8 == 0
    s_x, batch, in_dim = x.shape
    assert s_x in (1, n_samples)
    assert in_dim == prep["in_dim"]

    flat = prep["flat"]
    dp, op = prep["dp"], prep["op"]
    hidden_wps = prep["hidden_wps"]
    num_hidden = prep["num_hidden"]
    wdtype = prep["weight_dtype"]
    out_dim = prep["out_dim"]
    max_wp = max(hidden_wps) if hidden_wps else op

    # ---- collapse (samples, batch) into the matmul M dimension ------------------------
    bp = _round_up(batch, 8)                       # per-sample padded row stride
    R = n_samples * bp
    n_blocks = max(1, _cdiv(R, row_tile))
    bt = _round_up(_cdiv(R, n_blocks), 8)          # balanced row tiles, multiple of 8
    R_pad = n_blocks * bt

    if s_x == 1:
        x = jnp.broadcast_to(x, (n_samples, batch, in_dim))
    xp = jnp.zeros((n_samples, bp, dp), wdtype).at[:, :batch, :in_dim].set(x.astype(wdtype))
    xp = xp.reshape(R, dp)
    if R_pad > R:
        xp = jnp.pad(xp, ((0, R_pad - R), (0, 0)))

    # ---- VMEM budget & weight buffering ------------------------------------------------
    cap = _vmem_cap_bytes()
    param_bytes = sum(int(a.size) * a.dtype.itemsize for a in flat)
    x_itemsize = jnp.zeros((), wdtype).dtype.itemsize
    tile_bytes = bt * dp * x_itemsize + bt * op * 4
    act_bytes = bt * max(max_wp, op) * 4 * 6        # activations + dropout hash scratch
    single_buffer_weights = (2 * param_bytes + 2 * tile_bytes + act_bytes > cap) or \
                            (param_bytes > (8 << 20))
    w_buf = 1 if single_buffer_weights else 2
    demand = w_buf * param_bytes + 2 * tile_bytes + act_bytes + (4 << 20)
    vmem_limit = int(min(cap, max(32 << 20, demand)))

    # ---- grid & specs ------------------------------------------------------------------
    grid = (n_blocks,)
    in_specs = [pl.BlockSpec((bt, dp), lambda i: (i, 0))]
    for arr in flat:
        if single_buffer_weights:
            # grid-invariant params: one resident buffer is enough (frees half the weight VMEM)
            in_specs.append(pl.BlockSpec(arr.shape, lambda i: (0, 0),
                                         pipeline_mode=pl.Buffered(1)))
        else:
            in_specs.append(pl.BlockSpec(arr.shape, lambda i: (0, 0)))
    out_specs = pl.BlockSpec((bt, op), lambda i: (i, 0))

    kernel = _make_kernel(num_hidden, hidden_wps, max_wp, bt,
                          prep["dropout"], prep["apply_dropout"], int(seed))

    outp = pl.pallas_call(
        kernel,
        out_shape=jax.ShapeDtypeStruct((R_pad, op), jnp.float32),
        grid=grid,
        in_specs=in_specs,
        out_specs=out_specs,
        compiler_params=pltpu.CompilerParams(
            dimension_semantics=("parallel",),
            vmem_limit_bytes=vmem_limit,
        ),
    )(xp, *flat)

    return outp[:R].reshape(n_samples, bp, op)[:, :batch, :out_dim]


def _as_prepared(params, sample, dropout, weight_dtype):
    if isinstance(params, dict) and "flat" in params:
        return params
    return prepare_params(params, sample=sample, dropout=dropout, weight_dtype=weight_dtype)


def expected_return_forward(x, params, *, sample=True, dropout=0.3, seed=1234,
                            row_tile=512, weight_dtype=jnp.bfloat16):
    """forward(): x (n_samples, batch, in_dim) -> (n_samples, batch, out_dim)."""
    prep = _as_prepared(params, sample, dropout, weight_dtype)
    return _forward_prepared(x, x.shape[0], prep, seed=seed, row_tile=row_tile)


def mc_sample_predict(x2d, params, mc_samples, *, sample=True, dropout=0.3, seed=1234,
                      row_tile=512, weight_dtype=jnp.bfloat16):
    """sample_predict(): x2d (batch, in_dim) repeated over mc_samples MC-dropout draws."""
    prep = _as_prepared(params, sample, dropout, weight_dtype)
    return _forward_prepared(x2d[None], mc_samples, prep, seed=seed, row_tile=row_tile)


def init_params(key, in_dim, hidden_dim, out_dim):
    """Deterministic synthetic parameters (same shapes as the torch module)."""
    params = {"hidden": []}
    h_in = in_dim
    for h_out in hidden_dim:
        key, k1, k2, k3, k4, k5, k6 = jax.random.split(key, 7)
        w = jax.random.normal(k1, (h_in, h_out), jnp.float32) / jnp.sqrt(float(h_in))
        b = 0.1 * jax.random.normal(k2, (1, h_out), jnp.float32)
        gamma = 1.0 + 0.1 * jax.random.normal(k3, (1, h_out), jnp.float32)
        beta = 0.1 * jax.random.normal(k4, (1, h_out), jnp.float32)
        mean = 0.1 * jax.random.normal(k5, (1, h_out), jnp.float32)
        var = 1.0 + 0.1 * jax.random.uniform(k6, (1, h_out), jnp.float32)
        params["hidden"].append((w, b, gamma, beta, mean, var))
        h_in = h_out
    key, k1, k2 = jax.random.split(key, 3)
    w_out = jax.random.normal(k1, (h_in, out_dim), jnp.float32) / jnp.sqrt(float(h_in))
    b_out = 0.1 * jax.random.normal(k2, (1, out_dim), jnp.float32)
    params["out"] = (w_out, b_out)
    return params


def _reference_forward(x, params):
    """Pure-JAX reference (eval-mode BN, no dropout)."""
    h = x.astype(jnp.float32)
    for (w, b, gamma, beta, mean, var) in params["hidden"]:
        h = h @ w + b
        h = (h - mean) * (gamma * lax.rsqrt(var + BN_EPS)) + beta
        h = jnp.where(h > 0, h, LEAKY_SLOPE * h)
    w_out, b_out = params["out"]
    return h @ w_out + b_out


if __name__ == "__main__":
    # small shapes consistent with forward(x): x is (n_samples, batch, in_dim)
    mc_samples, batch, in_dim = 4, 8, 16
    hidden_dim = [32, 32]
    out_dim = 8

    root = jax.random.PRNGKey(0)
    kp, kx = jax.random.split(root)
    params = init_params(kp, in_dim, hidden_dim, out_dim)

    # run()/sample_predict() path: fold/pad params once, then MC-dropout across samples.
    prep_mc = prepare_params(params, sample=True, dropout=0.3)      # cache & reuse across calls
    x_single = jax.random.normal(kx, (batch, in_dim), jnp.float32)
    pred = mc_sample_predict(x_single, prep_mc, mc_samples)
    pred = jax.block_until_ready(pred)

    assert pred.shape == (mc_samples, batch, out_dim)
    assert bool(jnp.all(jnp.isfinite(pred)))
    # dropout masks must differ across MC samples
    assert float(jnp.max(jnp.std(pred, axis=0))) > 0.0

    # MC aggregation glue (plain JAX), matching run(): mean / biased std over samples
    pred_mu = jnp.mean(pred, axis=0)
    pred_sigma = jnp.std(pred + 1e-6, axis=0)
    jax.block_until_ready((pred_mu, pred_sigma))

    # general forward() path, deterministic (no dropout), f32 weights -> exact check vs reference
    x3 = jnp.broadcast_to(x_single[None], (mc_samples, batch, in_dim))
    pred_det = expected_return_forward(x3, params, sample=False, dropout=0.3,
                                       weight_dtype=jnp.float32)
    pred_det = jax.block_until_ready(pred_det)
    ref = _reference_forward(x3, params)
    assert pred_det.shape == (mc_samples, batch, out_dim)
    assert float(jnp.max(jnp.abs(pred_det - ref))) < 1e-3

    print("KERNEL_OK")
</pallas_src>

<mosaic_0001>
module attributes {stable_mosaic.version = 11 : i64} {
  func.func @kernel(%arg0: i32, %arg1: memref<32x128xbf16, #tpu.memory_space<vmem>>, %arg2: memref<128x128xbf16, #tpu.memory_space<vmem>>, %arg3: memref<1x128xf32, #tpu.memory_space<vmem>>, %arg4: memref<128x128xbf16, #tpu.memory_space<vmem>>, %arg5: memref<1x128xf32, #tpu.memory_space<vmem>>, %arg6: memref<128x128xbf16, #tpu.memory_space<vmem>>, %arg7: memref<1x128xf32, #tpu.memory_space<vmem>>, %arg8: memref<32x128xf32, #tpu.memory_space<vmem>>) attributes {dimension_semantics = [#tpu.dimension_semantics<parallel>], iteration_bounds = array<i64: 1>, scalar_prefetch = 0 : i64, scratch_operands = 0 : i64, tpu.core_type = #tpu.core_type<tc>, window_params = [{transform_indices = @transform_0, window_bounds = array<i64: 32, 128>}, {pipeline_mode = #tpu.pipeline_mode<synchronous>, transform_indices = @transform_1, window_bounds = array<i64: 128, 128>}, {pipeline_mode = #tpu.pipeline_mode<synchronous>, transform_indices = @transform_2, window_bounds = array<i64: 1, 128>}, {pipeline_mode = #tpu.pipeline_mode<synchronous>, transform_indices = @transform_3, window_bounds = array<i64: 128, 128>}, {pipeline_mode = #tpu.pipeline_mode<synchronous>, transform_indices = @transform_4, window_bounds = array<i64: 1, 128>}, {pipeline_mode = #tpu.pipeline_mode<synchronous>, transform_indices = @transform_5, window_bounds = array<i64: 128, 128>}, {pipeline_mode = #tpu.pipeline_mode<synchronous>, transform_indices = @transform_6, window_bounds = array<i64: 1, 128>}, {transform_indices = @transform_7, window_bounds = array<i64: 32, 128>}]} {
    %c32_i32 = arith.constant 32 : i32
    %0 = arith.muli %arg0, %c32_i32 : i32
    %1 = tpu.iota {dimensions = array<i32: 0>} : vector<32x128xi32>
    %2 = vector.broadcast %0 : i32 to vector<32x128xi32>
    %3 = arith.addi %1, %2 : vector<32x128xi32>
    %4 = tpu.iota {dimensions = array<i32: 1>} : vector<32x128xi32>
    %c-2048144789_i32 = arith.constant -2048144789 : i32
    %5 = vector.broadcast %c-2048144789_i32 : i32 to vector<32x128xi32>
    %6 = arith.muli %3, %5 : vector<32x128xi32>
    %7 = arith.addi %6, %4 : vector<32x128xi32>
    %c0 = arith.constant 0 : index
    %c0_0 = arith.constant 0 : index
    %8 = vector.load %arg1[%c0, %c0_0] : memref<32x128xbf16, #tpu.memory_space<vmem>>, vector<32x128xbf16>
    %c0_1 = arith.constant 0 : index
    %c0_2 = arith.constant 0 : index
    %9 = vector.load %arg2[%c0_1, %c0_2] : memref<128x128xbf16, #tpu.memory_space<vmem>>, vector<128x128xbf16>
    %cst = arith.constant dense<0.000000e+00> : vector<32x128xf32>
    %10 = tpu.matmul %8, %9, %cst {dimension_numbers = #tpu.dot_dimension_numbers<[1], [0], [0], [1], [0, 0, 1, 1], [], []>} : vector<32x128xbf16>, vector<128x128xbf16>, vector<32x128xf32> -> vector<32x128xf32>
    %c0_3 = arith.constant 0 : index
    %c0_4 = arith.constant 0 : index
    %11 = vector.load %arg3[%c0_3, %c0_4] : memref<1x128xf32, #tpu.memory_space<vmem>>, vector<1x128xf32>
    %12 = vector.broadcast %11 : vector<1x128xf32> to vector<32x128xf32>
    %13 = arith.addf %10, %12 : vector<32x128xf32>
    %cst_5 = arith.constant 0.000000e+00 : f32
    %14 = vector.broadcast %cst_5 : f32 to vector<32x128xf32>
    %15 = arith.cmpf ogt, %13, %14 : vector<32x128xf32>
    %cst_6 = arith.constant 0.00999999977 : f32
    %16 = vector.broadcast %cst_6 : f32 to vector<32x128xf32>
    %17 = arith.mulf %16, %13 : vector<32x128xf32>
    %18 = arith.select %15, %13, %17 : vector<32x128xi1>, vector<32x128xf32>
    %c1779034937_i32 = arith.constant 1779034937 : i32
    %19 = vector.broadcast %c1779034937_i32 : i32 to vector<32x128xi32>
    %20 = arith.xori %7, %19 : vector<32x128xi32>
    %c16_i32 = arith.constant 16 : i32
    %21 = vector.broadcast %c16_i32 : i32 to vector<32x128xi32>
    %22 = arith.shrsi %20, %21 : vector<32x128xi32>
    %c65535_i32 = arith.constant 65535 : i32
    %23 = vector.broadcast %c65535_i32 : i32 to vector<32x128xi32>
    %24 = arith.andi %22, %23 : vector<32x128xi32>
    %25 = arith.xori %20, %24 : vector<32x128xi32>
    %c-2048144789_i32_7 = arith.constant -2048144789 : i32
    %26 = vector.broadcast %c-2048144789_i32_7 : i32 to vector<32x128xi32>
    %27 = arith.muli %25, %26 : vector<32x128xi32>
    %c13_i32 = arith.constant 13 : i32
    %28 = vector.broadcast %c13_i32 : i32 to vector<32x128xi32>
    %29 = arith.shrsi %27, %28 : vector<32x128xi32>
    %c524287_i32 = arith.constant 524287 : i32
    %30 = vector.broadcast %c524287_i32 : i32 to vector<32x128xi32>
    %31 = arith.andi %29, %30 : vector<32x128xi32>
    %32 = arith.xori %27, %31 : vector<32x128xi32>
    %c-1028477387_i32 = arith.constant -1028477387 : i32
    %33 = vector.broadcast %c-1028477387_i32 : i32 to vector<32x128xi32>
    %34 = arith.muli %32, %33 : vector<32x128xi32>
    %c16_i32_8 = arith.constant 16 : i32
    %35 = vector.broadcast %c16_i32_8 : i32 to vector<32x128xi32>
    %36 = arith.shrsi %34, %35 : vector<32x128xi32>
    %c65535_i32_9 = arith.constant 65535 : i32
    %37 = vector.broadcast %c65535_i32_9 : i32 to vector<32x128xi32>
    %38 = arith.andi %36, %37 : vector<32x128xi32>
    %39 = arith.xori %34, %38 : vector<32x128xi32>
    %c2147483647_i32 = arith.constant 2147483647 : i32
    %40 = vector.broadcast %c2147483647_i32 : i32 to vector<32x128xi32>
    %41 = arith.andi %39, %40 : vector<32x128xi32>
    %c644245094_i32 = arith.constant 644245094 : i32
    %42 = vector.broadcast %c644245094_i32 : i32 to vector<32x128xi32>
    %43 = arith.cmpi sge, %41, %42 : vector<32x128xi32>
    %cst_10 = arith.constant 0.000000e+00 : f32
    %44 = vector.broadcast %cst_10 : f32 to vector<32x128xf32>
    %45 = arith.select %43, %18, %44 : vector<32x128xi1>, vector<32x128xf32>
    %46 = arith.truncf %45 : vector<32x128xf32> to vector<32x128xbf16>
    %c0_11 = arith.constant 0 : index
    %c0_12 = arith.constant 0 : index
    %47 = vector.load %arg4[%c0_11, %c0_12] : memref<128x128xbf16, #tpu.memory_space<vmem>>, vector<128x128xbf16>
    %cst_13 = arith.constant dense<0.000000e+00> : vector<32x128xf32>
    %48 = tpu.matmul %46, %47, %cst_13 {dimension_numbers = #tpu.dot_dimension_numbers<[1], [0], [0], [1], [0, 0, 1, 1], [], []>} : vector<32x128xbf16>, vector<128x128xbf16>, vector<32x128xf32> -> vector<32x128xf32>
    %c0_14 = arith.constant 0 : index
    %c0_15 = arith.constant 0 : index
    %49 = vector.load %arg5[%c0_14, %c0_15] : memref<1x128xf32, #tpu.memory_space<vmem>>, vector<1x128xf32>
    %50 = vector.broadcast %49 : vector<1x128xf32> to vector<32x128xf32>
    %51 = arith.addf %48, %50 : vector<32x128xf32>
    %cst_16 = arith.constant 0.000000e+00 : f32
    %52 = vector.broadcast %cst_16 : f32 to vector<32x128xf32>
    %53 = arith.cmpf ogt, %51, %52 : vector<32x128xf32>
    %cst_17 = arith.constant 0.00999999977 : f32
    %54 = vector.broadcast %cst_17 : f32 to vector<32x128xf32>
    %55 = arith.mulf %54, %51 : vector<32x128xf32>
    %56 = arith.select %53, %51, %55 : vector<32x128xi1>, vector<32x128xf32>
    %c-736898656_i32 = arith.constant -736898656 : i32
    %57 = vector.broadcast %c-736898656_i32 : i32 to vector<32x128xi32>
    %58 = arith.xori %7, %57 : vector<32x128xi32>
    %c16_i32_18 = arith.constant 16 : i32
    %59 = vector.broadcast %c16_i32_18 : i32 to vector<32x128xi32>
    %60 = arith.shrsi %58, %59 : vector<32x128xi32>
    %c65535_i32_19 = arith.constant 65535 : i32
    %61 = vector.broadcast %c65535_i32_19 : i32 to vector<32x128xi32>
    %62 = arith.andi %60, %61 : vector<32x128xi32>
    %63 = arith.xori %58, %62 : vector<32x128xi32>
    %c-2048144789_i32_20 = arith.constant -2048144789 : i32
    %64 = vector.broadcast %c-2048144789_i32_20 : i32 to vector<32x128xi32>
    %65 = arith.muli %63, %64 : vector<32x128xi32>
    %c13_i32_21 = arith.constant 13 : i32
    %66 = vector.broadcast %c13_i32_21 : i32 to vector<32x128xi32>
    %67 = arith.shrsi %65, %66 : vector<32x128xi32>
    %c524287_i32_22 = arith.constant 524287 : i32
    %68 = vector.broadcast %c524287_i32_22 : i32 to vector<32x128xi32>
    %69 = arith.andi %67, %68 : vector<32x128xi32>
    %70 = arith.xori %65, %69 : vector<32x128xi32>
    %c-1028477387_i32_23 = arith.constant -1028477387 : i32
    %71 = vector.broadcast %c-1028477387_i32_23 : i32 to vector<32x128xi32>
    %72 = arith.muli %70, %71 : vector<32x128xi32>
    %c16_i32_24 = arith.constant 16 : i32
    %73 = vector.broadcast %c16_i32_24 : i32 to vector<32x128xi32>
    %74 = arith.shrsi %72, %73 : vector<32x128xi32>
    %c65535_i32_25 = arith.constant 65535 : i32
    %75 = vector.broadcast %c65535_i32_25 : i32 to vector<32x128xi32>
    %76 = arith.andi %74, %75 : vector<32x128xi32>
    %77 = arith.xori %72, %76 : vector<32x128xi32>
    %c2147483647_i32_26 = arith.constant 2147483647 : i32
    %78 = vector.broadcast %c2147483647_i32_26 : i32 to vector<32x128xi32>
    %79 = arith.andi %77, %78 : vector<32x128xi32>
    %c644245094_i32_27 = arith.constant 644245094 : i32
    %80 = vector.broadcast %c644245094_i32_27 : i32 to vector<32x128xi32>
    %81 = arith.cmpi sge, %79, %80 : vector<32x128xi32>
    %cst_28 = arith.constant 0.000000e+00 : f32
    %82 = vector.broadcast %cst_28 : f32 to vector<32x128xf32>
    %83 = arith.select %81, %56, %82 : vector<32x128xi1>, vector<32x128xf32>
    %84 = arith.truncf %83 : vector<32x128xf32> to vector<32x128xbf16>
    %c0_29 = arith.constant 0 : index
    %c0_30 = arith.constant 0 : index
    %85 = vector.load %arg6[%c0_29, %c0_30] : memref<128x128xbf16, #tpu.memory_space<vmem>>, vector<128x128xbf16>
    %cst_31 = arith.constant dense<0.000000e+00> : vector<32x128xf32>
    %86 = tpu.matmul %84, %85, %cst_31 {dimension_numbers = #tpu.dot_dimension_numbers<[1], [0], [0], [1], [0, 0, 1, 1], [], []>} : vector<32x128xbf16>, vector<128x128xbf16>, vector<32x128xf32> -> vector<32x128xf32>
    %c0_32 = arith.constant 0 : index
    %c0_33 = arith.constant 0 : index
    %87 = vector.load %arg7[%c0_32, %c0_33] : memref<1x128xf32, #tpu.memory_space<vmem>>, vector<1x128xf32>
    %88 = vector.broadcast %87 : vector<1x128xf32> to vector<32x128xf32>
    %89 = arith.addf %86, %88 : vector<32x128xf32>
    %c0_34 = arith.constant 0 : index
    %c0_35 = arith.constant 0 : index
    %90 = vector.load %arg8[%c0_34, %c0_35] : memref<32x128xf32, #tpu.memory_space<vmem>>, vector<32x128xf32>
    tpu.vector_store %arg8[%c0_34, %c0_35], %89 {strides = array<i32>} : memref<32x128xf32, #tpu.memory_space<vmem>>, vector<32x128xf32>,
    return
  }
  func.func @transform_0(%arg0: i32) -> (i32, i32) {
    %c0_i32 = arith.constant 0 : i32
    %c0_i32_0 = arith.constant 0 : i32
    return %arg0, %c0_i32 : i32, i32
  }
  func.func @transform_1(%arg0: i32) -> (i32, i32) {
    %c0_i32 = arith.constant 0 : i32
    %c0_i32_0 = arith.constant 0 : i32
    %c0_i32_1 = arith.constant 0 : i32
    return %c0_i32, %c0_i32_0 : i32, i32
  }
  func.func @transform_2(%arg0: i32) -> (i32, i32) {
    %c0_i32 = arith.constant 0 : i32
    %c0_i32_0 = arith.constant 0 : i32
    %c0_i32_1 = arith.constant 0 : i32
    return %c0_i32, %c0_i32_0 : i32, i32
  }
  func.func @transform_3(%arg0: i32) -> (i32, i32) {
    %c0_i32 = arith.constant 0 : i32
    %c0_i32_0 = arith.constant 0 : i32
    %c0_i32_1 = arith.constant 0 : i32
    return %c0_i32, %c0_i32_0 : i32, i32
  }
  func.func @transform_4(%arg0: i32) -> (i32, i32) {
    %c0_i32 = arith.constant 0 : i32
    %c0_i32_0 = arith.constant 0 : i32
    %c0_i32_1 = arith.constant 0 : i32
    return %c0_i32, %c0_i32_0 : i32, i32
  }
  func.func @transform_5(%arg0: i32) -> (i32, i32) {
    %c0_i32 = arith.constant 0 : i32
    %c0_i32_0 = arith.constant 0 : i32
    %c0_i32_1 = arith.constant 0 : i32
    return %c0_i32, %c0_i32_0 : i32, i32
  }
  func.func @transform_6(%arg0: i32) -> (i32, i32) {
    %c0_i32 = arith.constant 0 : i32
    %c0_i32_0 = arith.constant 0 : i32
    %c0_i32_1 = arith.constant 0 : i32
    return %c0_i32, %c0_i32_0 : i32, i32
  }
  func.func @transform_7(%arg0: i32) -> (i32, i32) {
    %c0_i32 = arith.constant 0 : i32
    %c0_i32_0 = arith.constant 0 : i32
    return %arg0, %c0_i32 : i32, i32
  }
}

</mosaic_0001>

<bundles_post_ra>
// kernel: tpu_custom_call.1
= control target key start
LH: loop header
LB: loop body
LE: loop exit
PB: predicated region body
PF: predicated region fallthrough
CT: control target
= control target key end

     0   :  { %12 = vsyncpa [#allocation3], 0  ;;  %s976_s0 = inlined_call_operand.hbm [shape: bf16[32,128], index: 0, kind: input, shape index: {}]   ;;  %s977_s1 = inlined_call_operand.hbm [shape: bf16[128,128], index: 1, kind: input, shape index: {}]   ;;  %s978_s2 = inlined_call_operand.vmem [shape: f32[1,128], index: 2, kind: input, shape index: {}]   ;;  %s979_s3 = inlined_call_operand.hbm [shape: bf16[128,128], index: 3, kind: input, shape index: {}]   ;;  %s980_s4 = inlined_call_operand.vmem [shape: f32[1,128], index: 4, kind: input, shape index: {}]   ;;  %s981_s5 = inlined_call_operand.hbm [shape: bf16[128,128], index: 5, kind: input, shape index: {}]   ;;  %s982_s6 = inlined_call_operand.vmem [shape: f32[1,128], index: 6, kind: input, shape index: {}]   ;;  %s983_s7 = inlined_call_operand.hbm [shape: f32[32,128], index: 7, kind: output, shape index: {}]  }
   0x1   :  { %13 = vsyncpa [#allocation6], 0 }
   0x2   :  { %14 = vsyncpa [#allocation9], 0 }
   0x3   :  { %15 = vsyncpa [#allocation4], 0  ;;  %s33_s26 = sshll.u32 %s977_s1, 4  ;;  %s875_s27 = smov [#allocation5]   ;;  %s34_s26 = int_to_ptr.hbm [resolvable:$true] %s33_s26 }
   0x4   :  { %s35_s28 = sshll.u32 %s875_s27, 4  ;;  %s20_s8 = sshll.u32 %s976_s0, 4  ;;  %s36_s28 = int_to_ptr.vmem [resolvable:$true] %s35_s28  ;;  %s21_s8 = int_to_ptr.hbm [resolvable:$true] %s20_s8 }
   0x5   :  { %s876_s9 = smov 64   ;;  %s877_s10 = smov 4  }
   0x6   :  { %41 = dma.hbm_to_vmem [thread:$0]  %s34_s26, 1024, %s36_s28, [#allocation6], %s876_s9, %s876_s9, %s877_s10  }
   0x7   :  { %s878_s11 = smov [#allocation2]   ;;  %s48_s15 = sshll.u32 %s979_s3, 4  ;;  %s49_s15 = int_to_ptr.hbm [resolvable:$true] %s48_s15 }
   0x8   :  { %s22_s12 = sshll.u32 %s878_s11, 4  ;;  %s63_s17 = sshll.u32 %s981_s5, 4  ;;  %s23_s12 = int_to_ptr.vmem [resolvable:$true] %s22_s12  ;;  %s64_s17 = int_to_ptr.hbm [resolvable:$true] %s63_s17 }
   0x9   :  { %28 = dma.hbm_to_vmem [thread:$0]  %s21_s8, 256, %s23_s12, [#allocation3], %s876_s9, %s876_s9, %s877_s10  }
   0xa   :  { %s879_s18 = smov [#allocation7]   ;;  %s880_s0 = smov [#allocation8]  }
   0xb   :  { %s50_s19 = sshll.u32 %s879_s18, 4  ;;  %s65_s20 = sshll.u32 %s880_s0, 4  ;;  %s51_s19 = int_to_ptr.vmem [resolvable:$true] %s50_s19  ;;  %s66_s20 = int_to_ptr.vmem [resolvable:$true] %s65_s20 }
   0xc   :  { %56 = dma.hbm_to_vmem [thread:$0]  %s49_s15, 1024, %s51_s19, [#allocation6], %s876_s9, %s876_s9, %s877_s10  }
   0xd   :  { %71 = dma.hbm_to_vmem [thread:$0]  %s64_s17, 1024, %s66_s20, [#allocation9], %s876_s9, %s876_s9, %s877_s10  }
   0xe   :  { %867 = dma.done.wait [#allocation3], 256  }
   0xf   :  { %868 = vsyncadd [#allocation3], 4294967040 }
  0x10   :  { %869 = dma.done.wait [#allocation6], 2048  }
  0x11   :  { %870 = vsyncadd [#allocation6], 4294965248 }
  0x12   :  { %871 = dma.done.wait [#allocation9], 1024  }
  0x13   :  { %872 = vsyncadd [#allocation9], 4294966272  ;;  %v710_v0 = vld [vmem:[#allocation5 + $0x38] sm:$0xff]  ;;  %v709_v1 = vld [vmem:[#allocation5 + $0x30] sm:$0xff]  ;;  %v91_v14 = vlaneseq  ;;  %s881_s23 = smov [#allocation10]   ;;  %s546_s27 = sshll.u32 %s983_s7, 4  ;;  %s547_s27 = int_to_ptr.hbm [resolvable:$true] %s546_s27 }
  0x14   :  { %195 = vmatpush.bf16.msra.mxu0 %v710_v0  ;;  %727 = vmatpush.bf16.msra.mxu3 %v710_v0  ;;  %v718_v2 = vld [vmem:[#allocation7 + $0x38] sm:$0xff]  ;;  %v717_v3 = vld [vmem:[#allocation7 + $0x30] sm:$0xff]  ;;  %v708_v4 = vld [vmem:[#allocation5 + $0x28] sm:$0xff]  ;;  %s544_s24 = sshll.u32 %s881_s23, 4  ;;  %s883_s28 = smov 8   ;;  %s545_s24 = int_to_ptr.vmem [resolvable:$true] %s544_s24 }
  0x15   :  { %356 = vmatpush.bf16.msra.mxu1 %v718_v2  ;;  %v716_v5 = vld [vmem:[#allocation7 + $0x28] sm:$0xff]  ;;  %v707_v6 = vld [vmem:[#allocation5 + $0x20] sm:$0xff]  ;;  %v706_v8 = vld [vmem:[#allocation5 + $0x18] sm:$0xff]  ;;  %v92_v15 = vshrl.u32 %v91_v14, 7  ;;  %v102_v17 = vand.u32 127, %v91_v14 }
  0x16   :  { %v715_v7 = vld [vmem:[#allocation7 + $0x20] sm:$0xff]  ;;  %v705_v9 = vld [vmem:[#allocation5 + $0x10] sm:$0xff]  ;;  %v704_v10 = vld [vmem:[#allocation5 + $0x8] sm:$0xff] }
  0x17   :  { %v703_v11 = vld [vmem:[#allocation5] sm:$0xff]  ;;  %v701_v12 = vld [vmem:[#allocation2] sm:$0xff]  ;;  %v702_v13 = vld [vmem:[#allocation2 + $0x8] sm:$0xff]  ;;  %v93_v16 = vadd.s32 8, %v92_v15  ;;  %v103_v18 = vmul.u32 2246822507, %v92_v15 }
  0x18   :  { %196 = vmatpush.bf16.msra.mxu0 %v709_v1  ;;  %728 = vmatpush.bf16.msra.mxu3 %v709_v1  ;;  %v714_v22 = vld [vmem:[#allocation7 + $0x18] sm:$0xff]  ;;  %v713_v25 = vld [vmem:[#allocation7 + $0x10] sm:$0xff]  ;;  %v94_v28 = vadd.s32 16, %v92_v15  ;;  %v95_v29 = vadd.s32 24, %v92_v15  ;;  %v712_v30 = vld [vmem:[#allocation7 + $0x8] sm:$0xff] }
  0x19   :  { %357 = vmatpush.bf16.msra.mxu1 %v717_v3  ;;  %v104_v19 = vmul.u32 2246822507, %v93_v16  ;;  %v936_v20 = vadd.s32 %v103_v18, %v102_v17  ;;  %v711_v35 = vld [vmem:[#allocation7] sm:$0xff]  ;;  %v726_v57 = vld [vmem:[#allocation8 + $0x38] sm:$0xff]  ;;  %v744_v58 = vld [vmem:[%s978_s2] ss:$0 sm:$0xff] }
  0x1a   :  { %v105_v33 = vmul.u32 2246822507, %v94_v28  ;;  %v106_v34 = vmul.u32 2246822507, %v95_v29  ;;  %517 = vmatpush.bf16.msra.mxu2 %v726_v57  ;;  %v725_v63 = vld [vmem:[#allocation8 + $0x30] sm:$0xff]  ;;  %v723_v14 = vld [vmem:[#allocation8 + $0x20] sm:$0xff] }
  0x1b   :  { %v938_v21 = vadd.s32 %v104_v19, %v102_v17  ;;  %v226_v23 = vxor.u32 1779034937, %v936_v20 }
  0x1c   :  { %197 = vmatpush.bf16.msra.mxu0 %v708_v4  ;;  %729 = vmatpush.bf16.msra.mxu3 %v708_v4  ;;  %v942_v38 = vadd.s32 %v105_v33, %v102_v17  ;;  %v944_v39 = vadd.s32 %v106_v34, %v102_v17 }
  0x1d   :  { %358 = vmatpush.bf16.msra.mxu1 %v716_v5  ;;  %v227_v24 = vxor.u32 1779034937, %v938_v21  ;;  %v601_v26 = vshrl.u32 %v226_v23, 16 }
  0x1e   :  { %v228_v42 = vxor.u32 1779034937, %v942_v38  ;;  %v229_v43 = vxor.u32 1779034937, %v944_v39  ;;  %518 = vmatpush.bf16.msra.mxu2 %v725_v63 }
  0x1f   :  { %v602_v27 = vshrl.u32 %v227_v24, 16  ;;  %v238_v31 = vxor.u32 %v601_v26, %v226_v23 }
  0x20   :  { %198 = vmatpush.bf16.msra.mxu0 %v707_v6  ;;  %730 = vmatpush.bf16.msra.mxu3 %v707_v6  ;;  %v603_v46 = vshrl.u32 %v228_v42, 16  ;;  %v604_v47 = vshrl.u32 %v229_v43, 16  ;;  %v724_v6 = vld [vmem:[#allocation8 + $0x28] sm:$0xff] }
  0x21   :  { %359 = vmatpush.bf16.msra.mxu1 %v715_v7  ;;  %v239_v32 = vxor.u32 %v602_v27, %v227_v24  ;;  %v242_v36 = vmul.u32 2246822507, %v238_v31 }
  0x22   :  { %v240_v50 = vxor.u32 %v603_v46, %v228_v42  ;;  %v241_v51 = vxor.u32 %v604_v47, %v229_v43  ;;  %519 = vmatpush.bf16.msra.mxu2 %v724_v6  ;;  %v720_v43 = vld [vmem:[#allocation8 + $0x8] sm:$0xff]  ;;  %v719_v46 = vld [vmem:[#allocation8] sm:$0xff] }
  0x23   :  { %v243_v37 = vmul.u32 2246822507, %v239_v32  ;;  %v605_v40 = vshrl.u32 %v242_v36, 13 }
  0x24   :  { %199 = vmatpush.bf16.msra.mxu0 %v706_v8  ;;  %731 = vmatpush.bf16.msra.mxu3 %v706_v8  ;;  %v244_v54 = vmul.u32 2246822507, %v240_v50  ;;  %v245_v55 = vmul.u32 2246822507, %v241_v51  ;;  %v389_v51 = vxor.u32 3558068640, %v942_v38 }
  0x25   :  { %360 = vmatpush.bf16.msra.mxu1 %v714_v22  ;;  %v606_v41 = vshrl.u32 %v243_v37, 13  ;;  %v254_v44 = vxor.u32 %v605_v40, %v242_v36  ;;  %v387_v36 = vxor.u32 3558068640, %v936_v20  ;;  %v721_v40 = vld [vmem:[#allocation8 + $0x10] sm:$0xff]  ;;  %v390_v20 = vxor.u32 3558068640, %v944_v39 }
  0x26   :  { %v607_v61 = vshrl.u32 %v244_v54, 13  ;;  %v608_v62 = vshrl.u32 %v245_v55, 13  ;;  %520 = vmatpush.bf16.msra.mxu2 %v723_v14 }
  0x27   :  { %v255_v45 = vxor.u32 %v606_v41, %v243_v37  ;;  %v258_v48 = vmul.u32 3266489909, %v254_v44  ;;  %v388_v37 = vxor.u32 3558068640, %v938_v21  ;;  %v651_v41 = vshrl.u32 %v387_v36, 16 }
  0x28   :  { %200 = vmatpush.bf16.msra.mxu0 %v705_v9  ;;  %732 = vmatpush.bf16.msra.mxu3 %v705_v9  ;;  %v256_v4 = vxor.u32 %v607_v61, %v244_v54  ;;  %v257_v5 = vxor.u32 %v608_v62, %v245_v55  ;;  %v654_v54 = vshrl.u32 %v390_v20, 16 }
  0x29   :  { %361 = vmatpush.bf16.msra.mxu1 %v713_v25  ;;  %v259_v49 = vmul.u32 3266489909, %v255_v45  ;;  %v609_v52 = vshrl.u32 %v258_v48, 16  ;;  %v652_v42 = vshrl.u32 %v388_v37, 16  ;;  %v399_v44 = vxor.u32 %v651_v41, %v387_v36 }
  0x2b   :  { %v610_v53 = vshrl.u32 %v259_v49, 16  ;;  %v270_v59 = vxor.u32 %v609_v52, %v258_v48  ;;  %v400_v45 = vxor.u32 %v652_v42, %v388_v37  ;;  %v403_v47 = vmul.u32 2246822507, %v399_v44 }
  0x2c   :  { %201 = vmatpush.bf16.msra.mxu0 %v704_v10  ;;  %733 = vmatpush.bf16.msra.mxu3 %v704_v10 }
  0x2d   :  { %362 = vmatpush.bf16.msra.mxu1 %v712_v30  ;;  %v271_v60 = vxor.u32 %v610_v53, %v259_v49  ;;  %v274_v1 = vand.u32 2147483647, %v270_v59  ;;  %v404_v48 = vmul.u32 2246822507, %v400_v45  ;;  %v655_v49 = vshrl.u32 %v403_v47, 13 }
  0x2e   :  { %v653_v53 = vshrl.u32 %v389_v51, 16 }
  0x2f   :  { %v275_v2 = vand.u32 2147483647, %v271_v60  ;;  %vm951_vm0 = vcmp.ge.s32.totalorder %v274_v1, 644245094  ;;  %v656_v50 = vshrl.u32 %v404_v48, 13  ;;  %v415_v52 = vxor.u32 %v655_v49, %v403_v47 }
  0x30   :  { %202 = vmatpush.bf16.msra.mxu0 %v703_v11  ;;  %734 = vmatpush.bf16.msra.mxu3 %v703_v11  ;;  %v401_v57 = vxor.u32 %v653_v53, %v389_v51 }
  0x31   :  { %363 = vmatpush.bf16.msra.mxu1 %v711_v35  ;;  %vm955_vm1 = vcmp.ge.s32.totalorder %v275_v2, 644245094  ;;  %v722_v35 = vld [vmem:[#allocation8 + $0x18] sm:$0xff]  ;;  %v416_v21 = vxor.u32 %v656_v50, %v404_v48  ;;  %v419_v55 = vmul.u32 3266489909, %v415_v52 }
  0x32   :  { %vm645_vm4 = vmpackc.low %vm955_vm1, %vm951_vm0  ;;  %521 = vmatpush.bf16.msra.mxu2 %v722_v35  ;;  %v405_v61 = vmul.u32 2246822507, %v401_v57 }
  0x33   :  { %203 = vmatmul.bf16.vlgmr.msra.gmra.mxu0 %v701_v12  ;;  %208 = vmatmul.bf16.vlgmr.msra.gmra.mxu3 %v702_v13  ;;  %v260_v12 = vmul.u32 3266489909, %v256_v4  ;;  %v261_v13 = vmul.u32 3266489909, %v257_v5  ;;  %v659_v59 = vshrl.u32 %v419_v55, 16 }
  0x34   :  { %v657_v39 = vshrl.u32 %v405_v61, 13 }
  0x35   :  { %v611_v19 = vshrl.u32 %v260_v12, 16  ;;  %v612_v22 = vshrl.u32 %v261_v13, 16  ;;  %v431_v38 = vxor.u32 %v659_v59, %v419_v55 }
  0x36   :  { %522 = vmatpush.bf16.msra.mxu2 %v721_v40  ;;  %v417_v6 = vxor.u32 %v657_v39, %v405_v61 }
  0x37   :  { %v272_v24 = vxor.u32 %v611_v19, %v260_v12  ;;  %v273_v25 = vxor.u32 %v612_v22, %v261_v13  ;;  %v435_v4 = vand.u32 2147483647, %v431_v38 }
  0x38   :  { %v421_v11 = vmul.u32 3266489909, %v417_v6 }
  0x39   :  { %v276_v28 = vand.u32 2147483647, %v272_v24  ;;  %v277_v29 = vand.u32 2147483647, %v273_v25  ;;  %vm439_vm10 = vcmp.ge.s32.totalorder %v435_v4, 644245094 }
  0x3a   :  { %523 = vmatpush.bf16.msra.mxu2 %v720_v43 }
  0x3b   :  { %vm280_vm7 = vcmp.ge.s32.totalorder %v276_v28, 644245094  ;;  %vm281_vm8 = vcmp.ge.s32.totalorder %v277_v29, 644245094 }
  0x3c   :  { %vm648_vm9 = vmpackc.low %vm281_vm8, %vm280_vm7 }
  0x3e   :  { %524 = vmatpush.bf16.msra.mxu2 %v719_v46 }
  0xb0   :  { %v204_v56 = vpop.f32.mrf.mxu0 }
  0xb1   :  { %v205_v0 = vadd.f32 %v744_v58, %v204_v56  ;;  %v420_v56 = vmul.u32 3266489909, %v416_v21 }
  0xb3   :  { %v218_v8 = vmul.f32 0.01, %v205_v0  ;;  %vm214_vm2 = vcmp.gt.f32.partialorder %v205_v0, 0.0  ;;  %v660_v60 = vshrl.u32 %v420_v56, 16 }
  0xb5   :  { %v222_v16 = vsel %vm214_vm2, %v205_v0, %v218_v8  ;;  %v745_v0 = vld [vmem:[%s980_s4] ss:$0 sm:$0xff]  ;;  %v432_v1 = vxor.u32 %v660_v60, %v420_v56 }
  0xb6   :  { %v209_v3 = vpop.f32.mrf.mxu3 }
  0xb7   :  { %v210_v26 = vadd.f32 %v744_v58, %v209_v3  ;;  %v436_v5 = vand.u32 2147483647, %v432_v1 }
  0xb8   :  { %v206_v7 = vpop.f32.mrf.mxu0 }
  0xb9   :  { %v207_v9 = vadd.f32 %v744_v58, %v206_v7  ;;  %v220_v30 = vmul.f32 0.01, %v210_v26  ;;  %vm216_vm5 = vcmp.gt.f32.partialorder %v210_v26, 0.0  ;;  %vm440_vm11 = vcmp.ge.s32.totalorder %v436_v5, 644245094 }
  0xba   :  { %vm695_vm14 = vmpackc.low %vm440_vm11, %vm439_vm10 }
  0xbb   :  { %vm215_vm3 = vcmp.gt.f32.partialorder %v207_v9, 0.0  ;;  %v219_v15 = vmul.f32 0.01, %v207_v9  ;;  %v224_v32 = vsel %vm216_vm5, %v210_v26, %v220_v30 }
  0xbd   :  { %v223_v17 = vsel %vm215_vm3, %v207_v9, %v219_v15 }
  0xbe   :  { %v646_v18 = vpack.c.bf16 %v223_v17, %v222_v16  ;;  %v211_v23 = vpop.f32.mrf.mxu3  ;;  %v661_v17 = vshrl.u32 %v421_v11, 16 }
  0xbf   :  { %v212_v27 = vadd.f32 %v744_v58, %v211_v23  ;;  %v402_v58 = vxor.u32 %v654_v54, %v390_v20 }
  0xc0   :  { %647 = vmatmul.msk.bf16.vlgmr.msra.gmra.mxu1 %vm645_vm4, %v646_v18  ;;  %v433_v22 = vxor.u32 %v661_v17, %v421_v11 }
  0xc1   :  { %v221_v31 = vmul.f32 0.01, %v212_v27  ;;  %vm217_vm6 = vcmp.gt.f32.partialorder %v212_v27, 0.0  ;;  %v406_v62 = vmul.u32 2246822507, %v402_v58 }
  0xc2   :  { %v437_v25 = vand.u32 2147483647, %v433_v22 }
  0xc3   :  { %v225_v33 = vsel %vm217_vm6, %v212_v27, %v221_v31  ;;  %v658_v2 = vshrl.u32 %v406_v62, 13 }
  0xc4   :  { %v649_v34 = vpack.c.bf16 %v225_v33, %v224_v32  ;;  %vm441_vm0 = vcmp.ge.s32.totalorder %v437_v25, 644245094 }
  0xc5   :  { %v418_v7 = vxor.u32 %v658_v2, %v406_v62 }
  0xc7   :  { %v422_v12 = vmul.u32 3266489909, %v418_v7 }
  0xc9   :  { %v662_v18 = vshrl.u32 %v422_v12, 16 }
  0xcb   :  { %v434_v23 = vxor.u32 %v662_v18, %v422_v12 }
  0xcd   :  { %v438_v26 = vand.u32 2147483647, %v434_v23 }
  0xcf   :  { %vm442_vm1 = vcmp.ge.s32.totalorder %v438_v26, 644245094 }
  0xd0   :  { %650 = vmatmul.msk.bf16.gmra.mxu1 %vm648_vm9, %v649_v34  ;;  %vm698_vm3 = vmpackc.low %vm442_vm1, %vm441_vm0  ;;  %v746_v34 = vld [vmem:[%s982_s6] ss:$0 sm:$0xff]  ;;  %s882_s6 = smov 128  }
 0x13d   :  { %v365_v63 = vpop.f32.mrf.mxu1 }
 0x13e   :  { %v366_v3 = vadd.f32 %v745_v0, %v365_v63 }
 0x140   :  { %v379_v9 = vmul.f32 0.01, %v366_v3  ;;  %vm375_vm12 = vcmp.gt.f32.partialorder %v366_v3, 0.0 }
 0x142   :  { %v383_v14 = vsel %vm375_vm12, %v366_v3, %v379_v9 }
 0x145   :  { %v367_v8 = vpop.f32.mrf.mxu1 }
 0x146   :  { %v368_v10 = vadd.f32 %v745_v0, %v367_v8 }
 0x148   :  { %vm376_vm13 = vcmp.gt.f32.partialorder %v368_v10, 0.0  ;;  %v380_v13 = vmul.f32 0.01, %v368_v10 }
 0x14a   :  { %v384_v15 = vsel %vm376_vm13, %v368_v10, %v380_v13 }
 0x14b   :  { %v696_v16 = vpack.c.bf16 %v384_v15, %v383_v14 }
 0x14d   :  { %v370_v19 = vpop.f32.mrf.mxu1  ;;  %697 = vmatmul.msk.bf16.vlgmr.msra.gmra.mxu2 %vm695_vm14, %v696_v16 }
 0x14e   :  { %v371_v24 = vadd.f32 %v745_v0, %v370_v19 }
 0x150   :  { %v381_v28 = vmul.f32 0.01, %v371_v24  ;;  %vm377_vm15 = vcmp.gt.f32.partialorder %v371_v24, 0.0 }
 0x152   :  { %v385_v31 = vsel %vm377_vm15, %v371_v24, %v381_v28 }
 0x155   :  { %v372_v27 = vpop.f32.mrf.mxu1 }
 0x156   :  { %v373_v29 = vadd.f32 %v745_v0, %v372_v27 }
 0x158   :  { %vm378_vm2 = vcmp.gt.f32.partialorder %v373_v29, 0.0  ;;  %v382_v30 = vmul.f32 0.01, %v373_v29 }
 0x15a   :  { %v386_v32 = vsel %vm378_vm2, %v373_v29, %v382_v30 }
 0x15b   :  { %v699_v33 = vpack.c.bf16 %v386_v32, %v385_v31 }
 0x15d   :  { %700 = vmatmul.msk.bf16.gmra.mxu2 %vm698_vm3, %v699_v33 }
 0x1d0   :  { %v526_v35 = vpop.f32.mrf.mxu2 }
 0x1d1   :  { %v527_v36 = vadd.f32 %v746_v34, %v526_v35 }
 0x1d3   :  { %536 = vst [vmem:[#allocation10] sm:$0xff] %v527_v36 }
 0x1d8   :  { %v528_v37 = vpop.f32.mrf.mxu2 }
 0x1d9   :  { %v529_v40 = vadd.f32 %v746_v34, %v528_v37 }
 0x1db   :  { %537 = vst [vmem:[#allocation10 + $0x8] sm:$0xff] %v529_v40 }
 0x1e0   :  { %v531_v41 = vpop.f32.mrf.mxu2 }
 0x1e1   :  { %v532_v42 = vadd.f32 %v746_v34, %v531_v41 }
 0x1e3   :  { %538 = vst [vmem:[#allocation10 + $0x10] sm:$0xff] %v532_v42 }
 0x1e8   :  { %v533_v43 = vpop.f32.mrf.mxu2 }
 0x1e9   :  { %v534_v44 = vadd.f32 %v746_v34, %v533_v43 }
 0x1eb   :  { %539 = vst [vmem:[#allocation10 + $0x18] sm:$0xff] %v534_v44 }
 0x1ec   :  { %552 = dma.vmem_to_hbm [thread:$0]  %s545_s24, 512, %s547_s27, [#allocation4], %s882_s6, %s882_s6, %s883_s28  }
 0x1ed   :  { %873 = dma.done.wait [#allocation4], 512  }
 0x1ee   :  { %874 = vsyncadd [#allocation4], 4294966784 }
 0x1ef   :  { %557 = vsyncpa [#allocation3], 1 }
 0x1f0   :  { %558 = vsyncpa [#allocation6], 1 }
 0x1f1   :  { %559 = vsyncpa [#allocation9], 1 }
 0x1f2   :  { %560 = vsyncpa [#allocation4], 1 }

</bundles_post_ra>
